<compile_context>
chip_gen: v5e
topology: v5e:2x2
jax: 0.10.0
libtpu: 0.0.40
codegen_flags: <defaults>
</compile_context>

<pallas_src>
import math

import jax
import jax.numpy as jnp
from jax.experimental import pallas as pl
from jax.experimental.pallas import tpu as pltpu


def _moments_kernel(x_ref, y_ref, acc_ref):
    """Accumulate per-lane partial sums of x, y, x*y, x^2, y^2.

    x_ref, y_ref : (TILE_ROWS, LANE) f32 input tiles.
    acc_ref      : (5, 8, LANE) f32 output block, resident across grid axis 1
                   (the reduction axis) -> acts as the accumulator.
    """
    step = pl.program_id(1)

    @pl.when(step == 0)
    def _():
        acc_ref[...] = jnp.zeros_like(acc_ref)

    x = x_ref[...]
    y = y_ref[...]
    tr, lane = x.shape
    # Split the row axis on sublane (8) boundaries: layout-preserving reshape,
    # so the reduction over the leading axis stays as plain vector adds (VPU).
    xr = x.reshape(tr // 8, 8, lane)
    yr = y.reshape(tr // 8, 8, lane)

    acc_ref[0] += jnp.sum(xr, axis=0)        # sum_x
    acc_ref[1] += jnp.sum(yr, axis=0)        # sum_y
    acc_ref[2] += jnp.sum(xr * yr, axis=0)   # sum_xy
    acc_ref[3] += jnp.sum(xr * xr, axis=0)   # sum_x2
    acc_ref[4] += jnp.sum(yr * yr, axis=0)   # sum_y2


def pearson1_loss(preds, labels, *, max_tile_rows=512, pref_lane=1024, n_cores=2):
    """Pallas implementation of Pearson1.forward(preds, labels)."""
    assert preds.shape == labels.shape
    n_leading = preds.shape[0]               # the "N" of the PyTorch module

    x = preds.astype(jnp.float32).reshape(-1)
    y = labels.astype(jnp.float32).reshape(-1)
    total = x.shape[0]

    # ---- choose a lane-dense geometry (no padding when shapes divide) ----
    lane = None
    for cand in (1024, 512, 256, 128):
        if cand <= pref_lane and total >= cand and total % cand == 0:
            lane = cand
            break
    if lane is None:
        lane = 128 if total < pref_lane else pref_lane

    rows = math.ceil(total / lane)
    tile_rows = min(max_tile_rows, math.ceil(rows / n_cores))
    tile_rows = max(8, ((tile_rows + 7) // 8) * 8)
    steps = math.ceil(math.ceil(rows / n_cores) / tile_rows)
    rows_padded = n_cores * steps * tile_rows

    pad = rows_padded * lane - total
    if pad:
        # Zero padding is exact: zeros contribute nothing to any of the sums.
        x = jnp.pad(x, (0, pad))
        y = jnp.pad(y, (0, pad))
    x2 = x.reshape(rows_padded, lane)
    y2 = y.reshape(rows_padded, lane)

    in_spec = pl.BlockSpec((tile_rows, lane), lambda c, i: (c * steps + i, 0))
    # Leading size-1 block dim (per-core partials) is squeezed out of the
    # kernel ref; output block index is constant over axis 1 -> accumulator.
    out_spec = pl.BlockSpec((None, 5, 8, lane), lambda c, i: (c, 0, 0, 0))

    moments = pl.pallas_call(
        _moments_kernel,
        out_shape=jax.ShapeDtypeStruct((n_cores, 5, 8, lane), jnp.float32),
        grid_spec=pltpu.PrefetchScalarGridSpec(
            num_scalar_prefetch=0,
            grid=(n_cores, steps),
            in_specs=[in_spec, in_spec],
            out_specs=out_spec,
        ),
        compiler_params=pltpu.CompilerParams(
            dimension_semantics=("parallel", "arbitrary"),
            vmem_limit_bytes=32 * 1024 * 1024,
        ),
    )(x2, y2)

    # ---- tiny scalar epilogue in plain JAX ----
    sums = jnp.sum(moments, axis=(0, 2, 3))                 # (5,)
    sum_x, sum_y, sum_xy, sum_x2, sum_y2 = sums
    n = jnp.float32(n_leading)
    pearson = (n * sum_xy - sum_x * sum_y) / jnp.sqrt(
        (n * sum_x2 - sum_x * sum_x) * (n * sum_y2 - sum_y * sum_y)
    )
    # PyTorch: `pearson if pearson >= 0 else abs(pearson)`  ==  abs(pearson)
    return jnp.abs(pearson)


def pearson1_ref(preds, labels):
    """Plain-JAX reference mirroring the PyTorch module."""
    preds = preds.astype(jnp.float32)
    labels = labels.astype(jnp.float32)
    sum_x = jnp.sum(preds)
    sum_y = jnp.sum(labels)
    sum_xy = jnp.sum(preds * labels)
    sum_x2 = jnp.sum(preds ** 2)
    sum_y2 = jnp.sum(labels ** 2)
    N = jnp.float32(preds.shape[0])
    pearson = (N * sum_xy - sum_x * sum_y) / jnp.sqrt(
        (N * sum_x2 - sum_x ** 2) * (N * sum_y2 - sum_y ** 2)
    )
    return jnp.where(pearson >= 0, pearson, jnp.abs(pearson))


if __name__ == "__main__":
    key = jax.random.PRNGKey(0)
    k1, k2, k3, k4 = jax.random.split(key, 4)

    # Case 1: nicely shaped, positively correlated.
    N, D = 16, 128
    preds = jax.random.normal(k1, (N, D), dtype=jnp.float32)
    labels = 0.7 * preds + 0.3 * jax.random.normal(k2, (N, D), dtype=jnp.float32)
    loss = jax.block_until_ready(pearson1_loss(preds, labels))
    ref = pearson1_ref(preds, labels)
    assert jnp.allclose(loss, ref, rtol=1e-5, atol=1e-6), (loss, ref)

    # Case 2: ragged shape (exercises the padding path), negative correlation.
    N2, D2 = 6, 50
    p2 = jax.random.normal(k3, (N2, D2), dtype=jnp.float32)
    l2 = -0.5 * p2 + 0.2 * jax.random.normal(k4, (N2, D2), dtype=jnp.float32)
    loss2 = jax.block_until_ready(pearson1_loss(p2, l2))
    ref2 = pearson1_ref(p2, l2)
    assert jnp.allclose(loss2, ref2, rtol=1e-5, atol=1e-6), (loss2, ref2)

    print("KERNEL_OK")
</pallas_src>

<mosaic_0001>
module attributes {stable_mosaic.version = 11 : i64} {
  func.func @_moments_kernel(%arg0: i32, %arg1: i32, %arg2: memref<8x1024xf32, #tpu.memory_space<vmem>>, %arg3: memref<8x1024xf32, #tpu.memory_space<vmem>>, %arg4: memref<1x5x8x1024xf32, #tpu.memory_space<vmem>>) attributes {dimension_semantics = [#tpu.dimension_semantics<parallel>, #tpu.dimension_semantics<arbitrary>], iteration_bounds = array<i64: 2, 1>, scalar_prefetch = 0 : i64, scratch_operands = 0 : i64, tpu.core_type = #tpu.core_type<tc>, window_params = [{transform_indices = @transform_0, window_bounds = array<i64: 8, 1024>}, {transform_indices = @transform_1, window_bounds = array<i64: 8, 1024>}, {transform_indices = @transform_2, window_bounds = array<i64: 1, 5, 8, 1024>}]} {
    %c0_i32 = arith.constant 0 : i32
    %0 = arith.cmpi eq, %arg1, %c0_i32 : i32
    %1 = arith.extui %0 : i1 to i32
    %c0_i32_0 = arith.constant 0 : i32
    %2 = arith.cmpi ne, %1, %c0_i32_0 : i32
    scf.if %2 {
      %cst_44 = arith.constant 0.000000e+00 : f32
      %45 = vector.broadcast %cst_44 : f32 to vector<5x8x1024xf32>
      %c0_45 = arith.constant 0 : index
      %c0_46 = arith.constant 0 : index
      %c0_47 = arith.constant 0 : index
      %c0_48 = arith.constant 0 : index
      %46 = vector.load %arg4[%c0_45, %c0_46, %c0_47, %c0_48] : memref<1x5x8x1024xf32, #tpu.memory_space<vmem>>, vector<1x5x8x1024xf32>
      %47 = vector.shape_cast %46 : vector<1x5x8x1024xf32> to vector<5x8x1024xf32>
      %48 = vector.shape_cast %45 : vector<5x8x1024xf32> to vector<1x5x8x1024xf32>
      tpu.vector_store %arg4[%c0_45, %c0_46, %c0_47, %c0_48], %48 {strides = array<i32>} : memref<1x5x8x1024xf32, #tpu.memory_space<vmem>>, vector<1x5x8x1024xf32>,
    } else {
    }
    %c0 = arith.constant 0 : index
    %c0_1 = arith.constant 0 : index
    %3 = vector.load %arg2[%c0, %c0_1] : memref<8x1024xf32, #tpu.memory_space<vmem>>, vector<8x1024xf32>
    %c0_2 = arith.constant 0 : index
    %c0_3 = arith.constant 0 : index
    %4 = vector.load %arg3[%c0_2, %c0_3] : memref<8x1024xf32, #tpu.memory_space<vmem>>, vector<8x1024xf32>
    %5 = vector.shape_cast %3 : vector<8x1024xf32> to vector<1x8x1024xf32>
    %6 = vector.shape_cast %4 : vector<8x1024xf32> to vector<1x8x1024xf32>
    %c0_4 = arith.constant 0 : index
    %c0_5 = arith.constant 0 : index
    %c0_6 = arith.constant 0 : index
    %c0_7 = arith.constant 0 : index
    %7 = vector.load %arg4[%c0_4, %c0_5, %c0_6, %c0_7] : memref<1x5x8x1024xf32, #tpu.memory_space<vmem>>, vector<1x1x8x1024xf32>
    %8 = vector.shape_cast %7 : vector<1x1x8x1024xf32> to vector<8x1024xf32>
    %cst = arith.constant dense<0.000000e+00> : vector<8x1024xf32>
    %9 = vector.multi_reduction <add>, %5, %cst [0] : vector<1x8x1024xf32> to vector<8x1024xf32>
    %10 = arith.addf %8, %9 : vector<8x1024xf32>
    %c0_8 = arith.constant 0 : index
    %c0_9 = arith.constant 0 : index
    %c0_10 = arith.constant 0 : index
    %c0_11 = arith.constant 0 : index
    %11 = vector.load %arg4[%c0_8, %c0_9, %c0_10, %c0_11] : memref<1x5x8x1024xf32, #tpu.memory_space<vmem>>, vector<1x1x8x1024xf32>
    %12 = vector.shape_cast %11 : vector<1x1x8x1024xf32> to vector<8x1024xf32>
    %13 = vector.shape_cast %10 : vector<8x1024xf32> to vector<1x1x8x1024xf32>
    tpu.vector_store %arg4[%c0_8, %c0_9, %c0_10, %c0_11], %13 {strides = array<i32>} : memref<1x5x8x1024xf32, #tpu.memory_space<vmem>>, vector<1x1x8x1024xf32>,
    %c0_12 = arith.constant 0 : index
    %c1 = arith.constant 1 : index
    %c0_13 = arith.constant 0 : index
    %c0_14 = arith.constant 0 : index
    %14 = vector.load %arg4[%c0_12, %c1, %c0_13, %c0_14] : memref<1x5x8x1024xf32, #tpu.memory_space<vmem>>, vector<1x1x8x1024xf32>
    %15 = vector.shape_cast %14 : vector<1x1x8x1024xf32> to vector<8x1024xf32>
    %cst_15 = arith.constant dense<0.000000e+00> : vector<8x1024xf32>
    %16 = vector.multi_reduction <add>, %6, %cst_15 [0] : vector<1x8x1024xf32> to vector<8x1024xf32>
    %17 = arith.addf %15, %16 : vector<8x1024xf32>
    %c0_16 = arith.constant 0 : index
    %c1_17 = arith.constant 1 : index
    %c0_18 = arith.constant 0 : index
    %c0_19 = arith.constant 0 : index
    %18 = vector.load %arg4[%c0_16, %c1_17, %c0_18, %c0_19] : memref<1x5x8x1024xf32, #tpu.memory_space<vmem>>, vector<1x1x8x1024xf32>
    %19 = vector.shape_cast %18 : vector<1x1x8x1024xf32> to vector<8x1024xf32>
    %20 = vector.shape_cast %17 : vector<8x1024xf32> to vector<1x1x8x1024xf32>
    tpu.vector_store %arg4[%c0_16, %c1_17, %c0_18, %c0_19], %20 {strides = array<i32>} : memref<1x5x8x1024xf32, #tpu.memory_space<vmem>>, vector<1x1x8x1024xf32>,
    %c0_20 = arith.constant 0 : index
    %c2 = arith.constant 2 : index
    %c0_21 = arith.constant 0 : index
    %c0_22 = arith.constant 0 : index
    %21 = vector.load %arg4[%c0_20, %c2, %c0_21, %c0_22] : memref<1x5x8x1024xf32, #tpu.memory_space<vmem>>, vector<1x1x8x1024xf32>
    %22 = vector.shape_cast %21 : vector<1x1x8x1024xf32> to vector<8x1024xf32>
    %23 = arith.mulf %5, %6 : vector<1x8x1024xf32>
    %cst_23 = arith.constant dense<0.000000e+00> : vector<8x1024xf32>
    %24 = vector.multi_reduction <add>, %23, %cst_23 [0] : vector<1x8x1024xf32> to vector<8x1024xf32>
    %25 = arith.addf %22, %24 : vector<8x1024xf32>
    %c0_24 = arith.constant 0 : index
    %c2_25 = arith.constant 2 : index
    %c0_26 = arith.constant 0 : index
    %c0_27 = arith.constant 0 : index
    %26 = vector.load %arg4[%c0_24, %c2_25, %c0_26, %c0_27] : memref<1x5x8x1024xf32, #tpu.memory_space<vmem>>, vector<1x1x8x1024xf32>
    %27 = vector.shape_cast %26 : vector<1x1x8x1024xf32> to vector<8x1024xf32>
    %28 = vector.shape_cast %25 : vector<8x1024xf32> to vector<1x1x8x1024xf32>
    tpu.vector_store %arg4[%c0_24, %c2_25, %c0_26, %c0_27], %28 {strides = array<i32>} : memref<1x5x8x1024xf32, #tpu.memory_space<vmem>>, vector<1x1x8x1024xf32>,
    %c0_28 = arith.constant 0 : index
    %c3 = arith.constant 3 : index
    %c0_29 = arith.constant 0 : index
    %c0_30 = arith.constant 0 : index
    %29 = vector.load %arg4[%c0_28, %c3, %c0_29, %c0_30] : memref<1x5x8x1024xf32, #tpu.memory_space<vmem>>, vector<1x1x8x1024xf32>
    %30 = vector.shape_cast %29 : vector<1x1x8x1024xf32> to vector<8x1024xf32>
    %31 = arith.mulf %5, %5 : vector<1x8x1024xf32>
    %cst_31 = arith.constant dense<0.000000e+00> : vector<8x1024xf32>
    %32 = vector.multi_reduction <add>, %31, %cst_31 [0] : vector<1x8x1024xf32> to vector<8x1024xf32>
    %33 = arith.addf %30, %32 : vector<8x1024xf32>
    %c0_32 = arith.constant 0 : index
    %c3_33 = arith.constant 3 : index
    %c0_34 = arith.constant 0 : index
    %c0_35 = arith.constant 0 : index
    %34 = vector.load %arg4[%c0_32, %c3_33, %c0_34, %c0_35] : memref<1x5x8x1024xf32, #tpu.memory_space<vmem>>, vector<1x1x8x1024xf32>
    %35 = vector.shape_cast %34 : vector<1x1x8x1024xf32> to vector<8x1024xf32>
    %36 = vector.shape_cast %33 : vector<8x1024xf32> to vector<1x1x8x1024xf32>
    tpu.vector_store %arg4[%c0_32, %c3_33, %c0_34, %c0_35], %36 {strides = array<i32>} : memref<1x5x8x1024xf32, #tpu.memory_space<vmem>>, vector<1x1x8x1024xf32>,
    %c0_36 = arith.constant 0 : index
    %c4 = arith.constant 4 : index
    %c0_37 = arith.constant 0 : index
    %c0_38 = arith.constant 0 : index
    %37 = vector.load %arg4[%c0_36, %c4, %c0_37, %c0_38] : memref<1x5x8x1024xf32, #tpu.memory_space<vmem>>, vector<1x1x8x1024xf32>
    %38 = vector.shape_cast %37 : vector<1x1x8x1024xf32> to vector<8x1024xf32>
    %39 = arith.mulf %6, %6 : vector<1x8x1024xf32>
    %cst_39 = arith.constant dense<0.000000e+00> : vector<8x1024xf32>
    %40 = vector.multi_reduction <add>, %39, %cst_39 [0] : vector<1x8x1024xf32> to vector<8x1024xf32>
    %41 = arith.addf %38, %40 : vector<8x1024xf32>
    %c0_40 = arith.constant 0 : index
    %c4_41 = arith.constant 4 : index
    %c0_42 = arith.constant 0 : index
    %c0_43 = arith.constant 0 : index
    %42 = vector.load %arg4[%c0_40, %c4_41, %c0_42, %c0_43] : memref<1x5x8x1024xf32, #tpu.memory_space<vmem>>, vector<1x1x8x1024xf32>
    %43 = vector.shape_cast %42 : vector<1x1x8x1024xf32> to vector<8x1024xf32>
    %44 = vector.shape_cast %41 : vector<8x1024xf32> to vector<1x1x8x1024xf32>
    tpu.vector_store %arg4[%c0_40, %c4_41, %c0_42, %c0_43], %44 {strides = array<i32>} : memref<1x5x8x1024xf32, #tpu.memory_space<vmem>>, vector<1x1x8x1024xf32>,
    return
  }
  func.func @transform_0(%arg0: i32, %arg1: i32) -> (i32, i32) {
    %c1_i32 = arith.constant 1 : i32
    %0 = arith.muli %arg0, %c1_i32 : i32
    %1 = arith.addi %0, %arg1 : i32
    %c0_i32 = arith.constant 0 : i32
    %c0_i32_0 = arith.constant 0 : i32
    return %1, %c0_i32 : i32, i32
  }
  func.func @transform_1(%arg0: i32, %arg1: i32) -> (i32, i32) {
    %c1_i32 = arith.constant 1 : i32
    %0 = arith.muli %arg0, %c1_i32 : i32
    %1 = arith.addi %0, %arg1 : i32
    %c0_i32 = arith.constant 0 : i32
    %c0_i32_0 = arith.constant 0 : i32
    return %1, %c0_i32 : i32, i32
  }
  func.func @transform_2(%arg0: i32, %arg1: i32) -> (i32, i32, i32, i32) {
    %c0_i32 = arith.constant 0 : i32
    %c0_i32_0 = arith.constant 0 : i32
    %c0_i32_1 = arith.constant 0 : i32
    %c0_i32_2 = arith.constant 0 : i32
    return %arg0, %c0_i32, %c0_i32_0, %c0_i32_1 : i32, i32, i32, i32
  }
}

</mosaic_0001>

<bundles_post_ra>
// kernel: tpu_custom_call.1
= control target key start
LH: loop header
LB: loop body
LE: loop exit
PB: predicated region body
PF: predicated region fallthrough
CT: control target
= control target key end

     0   :  { %7 = vsyncpa [#allocation3], 0  ;;  %s1093_s0 = inlined_call_operand.hbm [shape: f32[16,1024], index: 0, kind: input, shape index: {}]   ;;  %s1094_s1 = inlined_call_operand.hbm [shape: f32[16,1024], index: 1, kind: input, shape index: {}]   ;;  %s1095_s2 = inlined_call_operand.hbm [shape: f32[2,5,8,1024], index: 2, kind: output, shape index: {}]  }
   0x1   :  { %9 = vsyncpa [#allocation3 + $0x1], 0 }
   0x2   :  { %10 = vsyncpa [#allocation6], 0 }
   0x3   :  { %12 = vsyncpa [#allocation6 + $0x1], 0 }
   0x4   :  { %13 = vsyncpa [#allocation4], 0 }
   0x5   :  { %15 = vsyncpa [#allocation4 + $0x1], 0  ;;  %s911_s9 = smov 0   ;;  %s913_s10 = smov 0  }
   0x6   :  { %s915_s11 = smov 0   ;;  %s917_s12 = smov 0  }
   0x7   :  { %s919_s13 = smov 0   ;;  %s921_s14 = smov 0  }
   0x8 LB: > { %s592_s15 = sadd.s32 4294967295, %s892_s14   ;;  %s593_s16 = sadd.s32 4294967294, %s892_s14   ;;  %s892_s14 = sphi %s921_s14, %s21_s14   ;;  %s888_s13 = sphi %s919_s13, %s1104_s13   ;;  %s884_s12 = sphi %s917_s12, %s1103_s12   ;;  %s880_s11 = sphi %s915_s11, %s1102_s11   ;;  %s876_s10 = sphi %s913_s10, %s1101_s10   ;;  %s872_s9 = sphi %s911_s9, %s1100_s9  }
   0x9   : > { %s33_s17 = sadd.s32 1, %s888_s13  ;;  %s42_s18 = sadd.s32 1, %s880_s11 }
   0xa   : > { %p35_p0 = scmp.ge.s32.totalorder %s33_s17, 2  ;;  %p49_p1 = scmp.ne.s32.totalorder %s880_s11, %s876_s10 }
   0xb   : > { %p50_p2 = scmp.eq.s32.totalorder %s892_s14, 0  ;;  %p55_p3 = scmp.ne.s32.totalorder %s876_s10, %s872_s9 }
   0xc   : > { %s1106_s17 = smov (%p35_p0, %s33_s17), 0  ;;  %p56_p5 = scmp.eq.s32.totalorder %s592_s15, 0 }
   0xd   : > { %p952_p4 = por %p50_p2, %p49_p1  ;;  %s39_s20 = ssub.s32 %s888_s13, %s1106_s17 }
   0xe   : > { %p107_p6 = scmp.eq.s32.totalorder %s592_s15, 1  ;;  %p40_p7 = scmp.eq.s32.totalorder %s39_s20, 0 }
   0xf   : > { %p958_p8 = por %p56_p5, %p55_p3  ;;  %p113_p10 = scmp.eq.s32.totalorder %s593_s16, 1 }
  0x10   : > { %p962_p9 = por %p107_p6, %p49_p1  ;;  %p595_p12 = scmp.ge.s32.totalorder %s892_s14, 2 }
  0x11   : > { %s967_s23 = scalar_select %p40_p7, %s880_s11, %s42_s18  }
  0x12   : > { %p969_p11 = por %p113_p10, %p55_p3  ;;  %p693_p13 = scmp.lt.s32.totalorder %s892_s14, 2 }
  0x13   : > { %s133_s25 = sand.u32 1, %s880_s11   ;;  %s672_s27 = sshll.u32 %s888_s13, 6 }
  0x14   : > { %s596_s26 = sshll.u32 %s133_s25, 6  ;;  %s143_s30 = scalar_lea.hbm %s1093_s0, %s672_s27 }
  0x15   : > { %s137_s3 = scalar_lea.vmem [#allocation2], %s596_s26  ;;  %s145_s5 = sshll.u32 %s143_s30, 4  ;;  %s146_s5 = int_to_ptr.hbm [resolvable:$true] %s145_s5 }
  0x16   : > { %s147_s4 = sshll.u32 %s137_s3, 4  ;;  %p683_p0 = pnand %p693_p13, %p952_p4  ;;  %s148_s4 = int_to_ptr.vmem [resolvable:$true] %s147_s4 }
  0x17   : > { %p602_p1 = scmp.ge.s32.totalorder %s892_s14, 1  ;;  %p173_p2 = scmp.lt.s32.totalorder %s892_s14, 3 }
  0x18   : > { %s134_s6 = scalar_lea.sflag [#allocation3], %s133_s25  ;;  %s164_s15 = scalar_lea.hbm %s1094_s1, %s672_s27 }
  0x19   : > { %685 = dma.hbm_to_vmem [thread:$0]  (!%p683_p0), %s146_s5, 1024, %s148_s4, %s134_s6  }
  0x1a   : > { %p174_p3 = pnand %p602_p1, %p173_p2  ;;  %s158_s16 = scalar_lea.vmem [#allocation5], %s596_s26 }
  0x1b   : > { %s168_s18 = sshll.u32 %s158_s16, 4  ;;  %s166_s20 = sshll.u32 %s164_s15, 4  ;;  %s169_s18 = int_to_ptr.vmem [resolvable:$true] %s168_s18  ;;  %s167_s20 = int_to_ptr.hbm [resolvable:$true] %s166_s20 }
  0x1c   : > { %s155_s28 = scalar_lea.sflag [#allocation6], %s133_s25  ;;  %177 = sbr.rel (%p174_p3) target bundleno = 82 (0x52), region = 28 }
  0x1d   : > { %688 = dma.hbm_to_vmem [thread:$0]  (!%p683_p0), %s167_s20, 1024, %s169_s18, %s155_s28  }
  0x1e   : > { %s988_s19 = sand.u32 (!%p174_p3), 1, %s876_s10  }
  0x1f   : > { %s603_s29 = sshll.u32 (!%p174_p3), %s988_s19, 6  ;;  %s180_s30 = scalar_lea.sflag (!%p174_p3), [#allocation3], %s988_s19 }
  0x20   : > { %s183_s3 = scalar_lea.vmem (!%p174_p3), [#allocation2], %s603_s29 }
  0x21   : > { %859 = dma.done.wait (%p958_p8), %s180_s30, 1024  }
  0x22   : > { %861 = vsyncadd (%p958_p8), %s180_s30, 4294966272  ;;  %s190_s26 = scalar_lea.sflag [#allocation6], %s988_s19  ;;  %s997_s25 = scalar_lea.vmem [#allocation5], %s603_s29 }
  0x23   : > { %863 = dma.done.wait (%p958_p8), %s190_s26, 1024  }
  0x24   : > { %865 = vsyncadd (%p958_p8), %s190_s26, 4294966272  ;;  %s674_s27 = smul.u32 320, %s988_s19  ;;  %v266_v0 = vld [vmem:[%s183_s3] sm:$0xff]  ;;  %v267_v1 = vld [vmem:[%s183_s3 + $0x8] sm:$0xff]  ;;  %s471_s15 = scalar_lea.sflag [#allocation4], %s988_s19 }
  0x25   : > { %v268_v2 = vld [vmem:[%s183_s3 + $0x10] sm:$0xff]  ;;  %v269_v3 = vld [vmem:[%s183_s3 + $0x18] sm:$0xff]  ;;  %v270_v4 = vld [vmem:[%s183_s3 + $0x20] sm:$0xff]  ;;  %v397_v24 = vmul.f32 %v266_v0, %v266_v0  ;;  %v398_v25 = vmul.f32 %v267_v1, %v267_v1  ;;  %s675_s21 = smul.u32 320, %s884_s12  ;;  %s826_s29 = scalar_lea.hbm %s1095_s2, 640 }
  0x26   : > { %s1004_s4 = scalar_lea.vmem [#allocation7], %s674_s27  ;;  %v271_v5 = vld [vmem:[%s183_s3 + $0x28] sm:$0xff]  ;;  %v272_v6 = vld [vmem:[%s183_s3 + $0x30] sm:$0xff]  ;;  %v273_v7 = vld [vmem:[%s183_s3 + $0x38] sm:$0xff]  ;;  %v399_v26 = vmul.f32 %v268_v2, %v268_v2  ;;  %v400_v27 = vmul.f32 %v269_v3, %v269_v3  ;;  %v401_v28 = vmul.f32 %v270_v4, %v270_v4 }
  0x27   : > { %306 = vst [vmem:[%s1004_s4] sm:$0xff] %v266_v0  ;;  %v274_v8 = vld [vmem:[%s997_s25] sm:$0xff]  ;;  %v275_v9 = vld [vmem:[%s997_s25 + $0x8] sm:$0xff]  ;;  %v276_v10 = vld [vmem:[%s997_s25 + $0x10] sm:$0xff]  ;;  %v402_v29 = vmul.f32 %v271_v5, %v271_v5  ;;  %v403_v30 = vmul.f32 %v272_v6, %v272_v6  ;;  %v404_v31 = vmul.f32 %v273_v7, %v273_v7  ;;  %s482_s7 = scalar_lea.hbm %s1095_s2, %s675_s21  ;;  %s483_s12 = sshll.u32 %s1004_s4, 4  ;;  %s484_s12 = int_to_ptr.vmem [resolvable:$true] %s483_s12 }
  0x28   : > { %307 = vst [vmem:[%s1004_s4 + $0x8] sm:$0xff] %v267_v1  ;;  %v277_v11 = vld [vmem:[%s997_s25 + $0x18] sm:$0xff]  ;;  %v278_v12 = vld [vmem:[%s997_s25 + $0x20] sm:$0xff]  ;;  %v279_v13 = vld [vmem:[%s997_s25 + $0x28] sm:$0xff]  ;;  %v356_v14 = vmul.f32 %v274_v8, %v266_v0  ;;  %v357_v16 = vmul.f32 %v275_v9, %v267_v1  ;;  %v358_v18 = vmul.f32 %v276_v10, %v268_v2  ;;  %v438_v32 = vmul.f32 %v274_v8, %v274_v8  ;;  %s485_s8 = sshll.u32 %s482_s7, 4  ;;  %s486_s8 = int_to_ptr.hbm [resolvable:$true] %s485_s8 }
  0x29   : > { %308 = vst [vmem:[%s1004_s4 + $0x10] sm:$0xff] %v268_v2  ;;  %v280_v15 = vld [vmem:[%s997_s25 + $0x30] sm:$0xff]  ;;  %v281_v17 = vld [vmem:[%s997_s25 + $0x38] sm:$0xff]  ;;  %v359_v19 = vmul.f32 %v277_v11, %v269_v3  ;;  %v360_v20 = vmul.f32 %v278_v12, %v270_v4  ;;  %v361_v21 = vmul.f32 %v279_v13, %v271_v5  ;;  %v439_v33 = vmul.f32 %v275_v9, %v275_v9  ;;  %s820_s16 = sshra.s32 %s486_s8, 4  ;;  %s821_s16 = int_to_ptr.hbm [resolvable:$true] %s820_s16 }
  0x2a   : > { %309 = vst [vmem:[%s1004_s4 + $0x18] sm:$0xff] %v269_v3  ;;  %v362_v22 = vmul.f32 %v280_v15, %v272_v6  ;;  %v363_v23 = vmul.f32 %v281_v17, %v273_v7  ;;  %v440_v34 = vmul.f32 %v276_v10, %v276_v10  ;;  %v441_v35 = vmul.f32 %v277_v11, %v277_v11  ;;  %s822_s18 = scalar_lea.hbm %s821_s16, 320  ;;  %p827_p7 = scmp.lt.s32.totalorder %s821_s16, %s1095_s2 }
  0x2b   : > { %310 = vst [vmem:[%s1004_s4 + $0x20] sm:$0xff] %v270_v4  ;;  %v442_v36 = vmul.f32 %v278_v12, %v278_v12  ;;  %v443_v37 = vmul.f32 %v279_v13, %v279_v13  ;;  %v444_v38 = vmul.f32 %v280_v15, %v280_v15  ;;  %v445_v39 = vmul.f32 %v281_v17, %v281_v17  ;;  %p823_p4 = scmp.ne.s32.totalorder %s821_s16, %s822_s18  ;;  %p828_p8 = scmp.lt.s32.totalorder %s826_s29, %s822_s18 }
  0x2c   : > { %311 = vst [vmem:[%s1004_s4 + $0x28] sm:$0xff] %v271_v5 }
  0x2d   : > { %312 = vst [vmem:[%s1004_s4 + $0x30] sm:$0xff] %v272_v6  ;;  %p824_p5 = pnand %p823_p4, %p962_p9  ;;  %p829_p10 = por %p828_p8, %p827_p7 }
  0x2e   : > { %313 = vst [vmem:[%s1004_s4 + $0x38] sm:$0xff] %v273_v7 }
  0x2f   : > { %613 = vst [vmem:[%s1004_s4 + $0x40] sm:$0xff] %v274_v8  ;;  %p825_p6 = pneg %p824_p5 }
  0x30   : > { %614 = vst [vmem:[%s1004_s4 + $0x48] sm:$0xff] %v275_v9 }
  0x31   : > { %615 = vst [vmem:[%s1004_s4 + $0x50] sm:$0xff] %v276_v10  ;;  %p830_p13 = pnand %p829_p10, %p825_p6 }
  0x32   : > { %616 = vst [vmem:[%s1004_s4 + $0x58] sm:$0xff] %v277_v11 }
  0x33   : > { %617 = vst [vmem:[%s1004_s4 + $0x60] sm:$0xff] %v278_v12 }
  0x34   : > { %618 = vst [vmem:[%s1004_s4 + $0x68] sm:$0xff] %v279_v13 }
  0x35   : > { %619 = vst [vmem:[%s1004_s4 + $0x70] sm:$0xff] %v280_v15 }
  0x36   : > { %620 = vst [vmem:[%s1004_s4 + $0x78] sm:$0xff] %v281_v17 }
  0x37   : > { %629 = vst [vmem:[%s1004_s4 + $0x80] sm:$0xff] %v356_v14 }
  0x38   : > { %630 = vst [vmem:[%s1004_s4 + $0x88] sm:$0xff] %v357_v16 }
  0x39   : > { %631 = vst [vmem:[%s1004_s4 + $0x90] sm:$0xff] %v358_v18 }
  0x3a   : > { %632 = vst [vmem:[%s1004_s4 + $0x98] sm:$0xff] %v359_v19 }
  0x3b   : > { %633 = vst [vmem:[%s1004_s4 + $0xa0] sm:$0xff] %v360_v20 }
  0x3c   : > { %634 = vst [vmem:[%s1004_s4 + $0xa8] sm:$0xff] %v361_v21 }
  0x3d   : > { %635 = vst [vmem:[%s1004_s4 + $0xb0] sm:$0xff] %v362_v22 }
  0x3e   : > { %636 = vst [vmem:[%s1004_s4 + $0xb8] sm:$0xff] %v363_v23 }
  0x3f   : > { %645 = vst [vmem:[%s1004_s4 + $0xc0] sm:$0xff] %v397_v24 }
  0x40   : > { %646 = vst [vmem:[%s1004_s4 + $0xc8] sm:$0xff] %v398_v25 }
  0x41   : > { %647 = vst [vmem:[%s1004_s4 + $0xd0] sm:$0xff] %v399_v26 }
  0x42   : > { %648 = vst [vmem:[%s1004_s4 + $0xd8] sm:$0xff] %v400_v27 }
  0x43   : > { %649 = vst [vmem:[%s1004_s4 + $0xe0] sm:$0xff] %v401_v28 }
  0x44   : > { %650 = vst [vmem:[%s1004_s4 + $0xe8] sm:$0xff] %v402_v29 }
  0x45   : > { %651 = vst [vmem:[%s1004_s4 + $0xf0] sm:$0xff] %v403_v30 }
  0x46   : > { %652 = vst [vmem:[%s1004_s4 + $0xf8] sm:$0xff] %v404_v31 }
  0x47   : > { %661 = vst [vmem:[%s1004_s4 + $0x100] sm:$0xff] %v438_v32 }
  0x48   : > { %662 = vst [vmem:[%s1004_s4 + $0x108] sm:$0xff] %v439_v33 }
  0x49   : > { %663 = vst [vmem:[%s1004_s4 + $0x110] sm:$0xff] %v440_v34 }
  0x4a   : > { %664 = vst [vmem:[%s1004_s4 + $0x118] sm:$0xff] %v441_v35 }
  0x4b   : > { %665 = vst [vmem:[%s1004_s4 + $0x120] sm:$0xff] %v442_v36 }
  0x4c   : > { %666 = vst [vmem:[%s1004_s4 + $0x128] sm:$0xff] %v443_v37 }
  0x4d   : > { %667 = vst [vmem:[%s1004_s4 + $0x130] sm:$0xff] %v444_v38 }
  0x4e   : > { %668 = vst [vmem:[%s1004_s4 + $0x138] sm:$0xff] %v445_v39 }
  0x4f   : > { %833 = shalt.err (!%p830_p13)
}
  0x50   : > { %s894_s19 = smov 1024   ;;  %s895_s26 = smov 64  }
  0x51   : > { %680 = dma.vmem_to_hbm [thread:$0]  (%p962_p9), %s484_s12, 5120, %s486_s8, %s471_s15, %s894_s19, %s894_s19, %s895_s26  }
  0x52 PF: > { %s500_s25 = sand.u32 1, %s872_s9   ;;  %p690_p0 = pnand %p595_p12, %p969_p11 }
  0x53   : > { %s501_s27 = scalar_lea.sflag [#allocation4], %s500_s25 }
  0x54   : > { %p691_p1 = pneg %p690_p0 }
  0x56   : > { %867 = dma.done.wait (%p691_p1), %s501_s27, 5120  }
  0x57   : > { %869 = vsyncadd (%p691_p1), %s501_s27, 4294962176  ;;  %s21_s14 = sadd.s32 1, %s892_s14   ;;  %s1100_s9 = smov %s876_s10 }
  0x58   : > { %p18_p2 = scmp.ge.s32.totalorder %s21_s14, 4   ;;  %s1101_s10 = smov %s880_s11 }
  0x59   : > { %s1102_s11 = smov %s967_s23  ;;  %s1103_s12 = smov %s888_s13 }
  0x5a   : > { %s1104_s13 = smov %s1106_s17  ;;  %20 = sbr.rel (!%p18_p2) target bundleno = 8 (0x8), region = 94 }
  0x5f   :  { %507 = vsyncpa [#allocation3], 1 }
  0x60   :  { %509 = vsyncpa [#allocation3 + $0x1], 1 }
  0x61   :  { %510 = vsyncpa [#allocation6], 1 }
  0x62   :  { %512 = vsyncpa [#allocation6 + $0x1], 1 }
  0x63   :  { %513 = vsyncpa [#allocation4], 1 }
  0x64   :  { %515 = vsyncpa [#allocation4 + $0x1], 1 }

</bundles_post_ra>
